<compile_context>
chip_gen: v7x
topology: tpu7x:2x2x1
jax: 0.10.0
libtpu: 0.0.40
codegen_flags: <defaults>
</compile_context>

<pallas_src>
import functools

import jax
import jax.numpy as jnp
from jax import lax
from jax.experimental import pallas as pl
from jax.experimental.pallas import tpu as pltpu


def _round_up(x, m):
    return (x + m - 1) // m * m


def _vmem_capacity_bytes():
    """Generation-aware VMEM capacity (v5e/v6e: 128 MiB, v7x: 64 MiB per TC)."""
    try:
        return int(pltpu.get_tpu_info().vmem_capacity_bytes)
    except Exception:            # conservative default if the query is unavailable
        return 64 << 20


# ===================== fused single-pass kernel (stride == 1 hot path) =====================

def _fused_conv_bn_relu_kernel(x_ref, w_ref, g_ref, b_ref, o_ref,
                               y_sc, sum_sc, sq_sc, scale_sc, shift_sc,
                               *, n_imgs, KH, KW, OH, OW, m_real, eps):
    # grid = (channel_blocks [parallel], 2*N [arbitrary]); i is the phase/image axis.
    i = pl.program_id(1)
    ocb = y_sc.shape[-1]

    @pl.when(i == 0)
    def _init():
        sum_sc[...] = jnp.zeros_like(sum_sc)
        sq_sc[...] = jnp.zeros_like(sq_sc)

    # ---------- phase 0: in-kernel tap expansion (no im2col) + batch statistics ----------
    @pl.when(i < n_imgs)
    def _conv_phase():
        def row_body(oh, carry):
            s_acc, q_acc = carry
            acc = jnp.zeros((OW, ocb), jnp.float32)
            for kh in range(KH):                      # taps are compile-time constants
                for kw in range(KW):
                    # (OW, C) bf16 window of the padded NHWC image, shifted by the tap
                    xt = x_ref[0, oh + kh, kw:kw + OW, :]
                    wt = w_ref[kh * KW + kw]          # (C, OCb) bf16
                    acc = acc + jnp.dot(xt, wt, preferred_element_type=jnp.float32)
            y_sc[i * OH + oh] = acc                   # stash pre-BN row in VMEM (f32)
            s_acc = s_acc + jnp.sum(acc, axis=0, keepdims=True)
            q_acc = q_acc + jnp.sum(acc * acc, axis=0, keepdims=True)
            return s_acc, q_acc

        zero = jnp.zeros((1, ocb), jnp.float32)
        s_tot, q_tot = lax.fori_loop(0, OH, row_body, (zero, zero))
        sum_sc[...] += s_tot
        sq_sc[...] += q_tot

    # ---------- statistics -> per-channel scale/shift (after the last image) ----------
    @pl.when(i == n_imgs - 1)
    def _finalize_stats():
        inv_m = 1.0 / m_real
        mean = sum_sc[...] * inv_m
        var = jnp.maximum(sq_sc[...] * inv_m - mean * mean, 0.0)   # biased var (PyTorch BN fwd)
        inv = lax.rsqrt(var + eps)
        scale = g_ref[...] * inv
        scale_sc[...] = scale
        shift_sc[...] = b_ref[...] - mean * scale

    # ---------- phase 1: tiled BN + ReLU, writeback pipelined by the out_spec ----------
    @pl.when(i >= n_imgs)
    def _bn_relu_phase():
        n2 = i - n_imgs
        y = y_sc[pl.ds(n2 * OH, OH)]                               # (OH, OW, OCb) f32
        o_ref[0] = jnp.maximum(y * scale_sc[...] + shift_sc[...], 0.0)


# ============================ two-pass fallback kernels ====================================

def _conv_stats_kernel(p_ref, w_ref, y_ref, sum_ref, sq_ref, acc_ref):
    # K-tiled conv matmul with an f32 accumulator; stats computed on the last K step.
    i = pl.program_id(0)
    k = pl.program_id(1)

    @pl.when((i == 0) & (k == 0))
    def _init_stats():
        sum_ref[...] = jnp.zeros_like(sum_ref)
        sq_ref[...] = jnp.zeros_like(sq_ref)

    @pl.when(k == 0)
    def _init_acc():
        acc_ref[...] = jnp.zeros_like(acc_ref)

    acc_ref[...] += jnp.dot(p_ref[...], w_ref[...], preferred_element_type=jnp.float32)

    @pl.when(k == pl.num_programs(1) - 1)
    def _emit():
        y = acc_ref[...]
        y_ref[...] = y.astype(y_ref.dtype)            # bf16 intermediate halves HBM roundtrip
        sum_ref[...] += jnp.sum(y, axis=0, keepdims=True)
        sq_ref[...] += jnp.sum(y * y, axis=0, keepdims=True)


def _bn_relu_kernel(y_ref, scale_ref, shift_ref, o_ref):
    y = y_ref[...].astype(jnp.float32)
    o_ref[...] = jnp.maximum(y * scale_ref[...] + shift_ref[...], 0.0)


# ================================== JAX wrapper ============================================

def _im2col_bf16(x, KH, KW, stride, padding, OH, OW, Mp, Kp):
    """Host-side im2col (fallback only).  Returns (Mp, Kp) bf16, zero padded."""
    N, C, _, _ = x.shape
    xp = jnp.pad(x, ((0, 0), (0, 0), (padding, padding), (padding, padding)))
    cols = []
    for kh in range(KH):
        for kw in range(KW):
            cols.append(xp[:, :, kh:kh + stride * OH:stride,
                              kw:kw + stride * OW:stride])
    p = jnp.stack(cols, axis=0).reshape(KH, KW, N, C, OH, OW)
    p = p.transpose(2, 4, 5, 3, 0, 1).reshape(N * OH * OW, C * KH * KW)
    p = p.astype(jnp.bfloat16)
    M, K = p.shape
    return jnp.pad(p, ((0, Mp - M), (0, Kp - K)))


def conv_unit_forward(x, weight, bias, gamma, beta, *, stride, padding,
                      eps=1e-5, fuse=None):
    """Forward pass of Conv_Unit.  x: [N, C, H, W] float32.  Returns NCHW float32."""
    del bias  # exactly cancelled by the training-mode BN mean subtraction
    N, C, H, W = x.shape
    OC, _, KH, KW = weight.shape
    OH = (H + 2 * padding - KH) // stride + 1
    OW = (W + 2 * padding - KW) // stride + 1
    M = N * OH * OW
    Hp, Wp = H + 2 * padding, W + 2 * padding
    T = KH * KW

    cap = _vmem_capacity_bytes()
    budget = int(0.80 * cap)

    # -------- fused-path per-core footprint (bf16 input slab, f32 resident activation) -----
    OCb = 128 if OC <= 128 else 256            # 256-wide N tiles feed 2x256^2 MXUs (v6e/v7x)
    OCp_f = _round_up(OC, OCb)
    n_cb = OCp_f // OCb
    fused_need = (2 * Hp * Wp * C * 2          # double-buffered bf16 input slab
                  + T * C * OCb * 2            # resident bf16 tap weights
                  + N * OH * OW * OCb * 4      # VMEM-resident pre-BN activation (per cb)
                  + 2 * OH * OW * OCb * 4      # double-buffered output block
                  + 16 * OCb * 4 + (1 << 16))  # stats/scale scratch + slack

    if fuse is None:
        fuse = fused_need <= int(0.60 * cap)
    fuse = bool(fuse) and stride == 1          # in-kernel tap path only supports stride 1

    g2 = gamma.astype(jnp.float32).reshape(1, OC)
    b2 = beta.astype(jnp.float32).reshape(1, OC)

    if fuse:
        # ---------------- single pallas_call: conv + stats + BN + ReLU ----------------
        vmem_limit = int(min(max(int(1.3 * fused_need), 32 << 20), budget))

        x_nhwc = jnp.transpose(x, (0, 2, 3, 1)).astype(jnp.bfloat16)
        x_pad = jnp.pad(x_nhwc, ((0, 0), (padding, padding), (padding, padding), (0, 0)))

        w_taps = jnp.transpose(weight, (2, 3, 1, 0)).reshape(T, C, OC)
        w_taps = jnp.pad(w_taps, ((0, 0), (0, 0), (0, OCp_f - OC))).astype(jnp.bfloat16)
        g_p = jnp.pad(g2, ((0, 0), (0, OCp_f - OC)))
        b_p = jnp.pad(b2, ((0, 0), (0, OCp_f - OC)))

        kernel = functools.partial(_fused_conv_bn_relu_kernel,
                                   n_imgs=N, KH=KH, KW=KW, OH=OH, OW=OW,
                                   m_real=float(M), eps=float(eps))

        # NOTE: w/g/b index maps only change with the (rare) channel-block axis, so their
        # double buffers are a few KiB of waste at most; pipeline_mode tuning skipped.
        out_nhwc = pl.pallas_call(
            kernel,
            out_shape=jax.ShapeDtypeStruct((N, OH, OW, OCp_f), jnp.float32),
            grid_spec=pltpu.PrefetchScalarGridSpec(
                num_scalar_prefetch=0,
                grid=(n_cb, 2 * N),
                in_specs=[
                    # padded NHWC image slab; clamped during phase 1 (no extra DMAs)
                    pl.BlockSpec((1, Hp, Wp, C),
                                 lambda cb, i: (jnp.minimum(i, N - 1), 0, 0, 0)),
                    pl.BlockSpec((T, C, OCb), lambda cb, i: (0, 0, cb)),
                    pl.BlockSpec((1, OCb), lambda cb, i: (0, cb)),
                    pl.BlockSpec((1, OCb), lambda cb, i: (0, cb)),
                ],
                out_specs=pl.BlockSpec(
                    (1, OH, OW, OCb),
                    lambda cb, i: (jnp.maximum(i - N, 0), 0, 0, cb)),
                scratch_shapes=[
                    pltpu.VMEM((N * OH, OW, OCb), jnp.float32),   # pre-BN activation
                    pltpu.VMEM((1, OCb), jnp.float32),            # sum
                    pltpu.VMEM((1, OCb), jnp.float32),            # sum of squares
                    pltpu.VMEM((1, OCb), jnp.float32),            # BN scale
                    pltpu.VMEM((1, OCb), jnp.float32),            # BN shift
                ]),
            compiler_params=pltpu.CompilerParams(
                dimension_semantics=("parallel", "arbitrary"),
                vmem_limit_bytes=vmem_limit),
        )(x_pad, w_taps, g_p, b_p)

        out = out_nhwc[:, :, :, :OC]
        return out.transpose(0, 3, 1, 2)   # NHWC -> NCHW (PyTorch contract; host-side glue)

    # ---------------- fallback: host im2col + K-tiled 2-pass ----------------
    OCp = _round_up(OC, 128)
    K = C * KH * KW
    if K <= 1024:
        Kp = _round_up(K, 16)
        tk = Kp
    else:
        tk = 512
        Kp = _round_up(K, tk)
    n_k = Kp // tk

    tm, p1_need = 16, None
    for cand in (1024, 512, 256, 128, 64, 32, 16):
        need = (2 * cand * tk * 2       # double-buffered bf16 patch tile
                + 2 * tk * OCp * 2      # double-buffered bf16 weight tile
                + cand * OCp * 4        # f32 accumulator scratch
                + 2 * cand * OCp * 2    # double-buffered bf16 y output tile
                + 16 * OCp * 4 + (1 << 16))
        p1_need = need
        if need <= int(0.55 * budget):
            tm = cand
            break
    tm = min(tm, _round_up(M, 16))
    Mp = _round_up(M, tm)
    vmem_limit = int(min(max(int(1.5 * p1_need), 32 << 20), budget))

    patches = _im2col_bf16(x, KH, KW, stride, padding, OH, OW, Mp, Kp)
    wmat = weight.reshape(OC, K).T                                   # (K, OC)
    wmat = jnp.pad(wmat, ((0, Kp - K), (0, OCp - OC))).astype(jnp.bfloat16)
    g_p = jnp.pad(g2, ((0, 0), (0, OCp - OC)))
    b_p = jnp.pad(b2, ((0, 0), (0, OCp - OC)))

    # pass 1: K-tiled conv matmul + batch statistics (y stored bf16)
    y_bf16, sums, sqs = pl.pallas_call(
        _conv_stats_kernel,
        out_shape=(jax.ShapeDtypeStruct((Mp, OCp), jnp.bfloat16),
                   jax.ShapeDtypeStruct((1, OCp), jnp.float32),
                   jax.ShapeDtypeStruct((1, OCp), jnp.float32)),
        grid_spec=pltpu.PrefetchScalarGridSpec(
            num_scalar_prefetch=0, grid=(Mp // tm, n_k),
            in_specs=[pl.BlockSpec((tm, tk), lambda i, k: (i, k)),
                      pl.BlockSpec((tk, OCp), lambda i, k: (k, 0))],
            out_specs=(pl.BlockSpec((tm, OCp), lambda i, k: (i, 0)),
                       pl.BlockSpec((1, OCp), lambda i, k: (0, 0)),
                       pl.BlockSpec((1, OCp), lambda i, k: (0, 0))),
            scratch_shapes=[pltpu.VMEM((tm, OCp), jnp.float32)]),
        compiler_params=pltpu.CompilerParams(
            dimension_semantics=("arbitrary", "arbitrary"),
            vmem_limit_bytes=vmem_limit),
    )(patches, wmat)

    mean = sums / M
    var = jnp.maximum(sqs / M - mean * mean, 0.0)
    inv = lax.rsqrt(var + eps)
    scale = g_p * inv
    shift = b_p - mean * scale

    # pass 2: fused BN affine + ReLU (bf16 in, f32 out)
    out_flat = pl.pallas_call(
        _bn_relu_kernel,
        out_shape=jax.ShapeDtypeStruct((Mp, OCp), jnp.float32),
        grid_spec=pltpu.PrefetchScalarGridSpec(
            num_scalar_prefetch=0, grid=(Mp // tm,),
            in_specs=[pl.BlockSpec((tm, OCp), lambda i: (i, 0)),
                      pl.BlockSpec((1, OCp), lambda i: (0, 0)),
                      pl.BlockSpec((1, OCp), lambda i: (0, 0))],
            out_specs=pl.BlockSpec((tm, OCp), lambda i: (i, 0))),
        compiler_params=pltpu.CompilerParams(
            dimension_semantics=("parallel",),
            vmem_limit_bytes=vmem_limit),
    )(y_bf16, scale, shift)

    out = out_flat[:M, :OC].reshape(N, OH, OW, OC)
    return out.transpose(0, 3, 1, 2)


# ================================ reference (check) ========================================

def _reference(x, weight, bias, gamma, beta, *, stride, padding, eps=1e-5):
    y = jax.lax.conv_general_dilated(
        x, weight, window_strides=(stride, stride),
        padding=[(padding, padding), (padding, padding)],
        dimension_numbers=("NCHW", "OIHW", "NCHW"))
    y = y + bias.reshape(1, -1, 1, 1)
    mean = jnp.mean(y, axis=(0, 2, 3), keepdims=True)
    var = jnp.mean((y - mean) ** 2, axis=(0, 2, 3), keepdims=True)
    yn = (y - mean) * jax.lax.rsqrt(var + eps)
    yn = yn * gamma.reshape(1, -1, 1, 1) + beta.reshape(1, -1, 1, 1)
    return jnp.maximum(yn, 0.0)


if __name__ == "__main__":
    # Conv_Unit(in_nodes=4, out_nodes=8, kernel_size=3, stride=1, padding=1)
    N, C_in, H, W = 2, 4, 16, 16
    OC, KH, KW = 8, 3, 3
    stride, padding = 1, 1

    key = jax.random.PRNGKey(0)
    k0, k1, k2, k3, k4 = jax.random.split(key, 5)
    x = jax.random.normal(k0, (N, C_in, H, W), dtype=jnp.float32)
    weight = 0.1 * jax.random.normal(k1, (OC, C_in, KH, KW), dtype=jnp.float32)
    bias = 0.1 * jax.random.normal(k2, (OC,), dtype=jnp.float32)
    gamma = 1.0 + 0.1 * jax.random.normal(k3, (OC,), dtype=jnp.float32)
    beta = 0.1 * jax.random.normal(k4, (OC,), dtype=jnp.float32)

    ref = _reference(x, weight, bias, gamma, beta, stride=stride, padding=padding)

    # fused single-pass path (auto-selected: activation fits the VMEM budget here)
    fwd_fused = jax.jit(functools.partial(conv_unit_forward,
                                          stride=stride, padding=padding))
    out = jax.block_until_ready(fwd_fused(x, weight, bias, gamma, beta))
    assert out.shape == (N, OC, H, W)
    # bf16 MXU inputs -> compare to the f32 reference at bf16-level tolerance
    assert jnp.allclose(out, ref, rtol=3e-2, atol=3e-2), "fused path mismatch"

    # two-pass fallback path (used for stride != 1 / activations too large for VMEM)
    fwd_2pass = jax.jit(functools.partial(conv_unit_forward,
                                          stride=stride, padding=padding,
                                          fuse=False))
    out2 = jax.block_until_ready(fwd_2pass(x, weight, bias, gamma, beta))
    assert jnp.allclose(out2, ref, rtol=3e-2, atol=3e-2), "two-pass path mismatch"

    print("KERNEL_OK")
</pallas_src>

<mosaic_0001>
module attributes {stable_mosaic.version = 11 : i64} {
  func.func @_fused_conv_bn_relu_kernel(%arg0: i32, %arg1: i32, %arg2: memref<1x18x18x4xbf16, #tpu.memory_space<vmem>>, %arg3: memref<9x4x128xbf16, #tpu.memory_space<vmem>>, %arg4: memref<1x128xf32, #tpu.memory_space<vmem>>, %arg5: memref<1x128xf32, #tpu.memory_space<vmem>>, %arg6: memref<1x16x16x128xf32, #tpu.memory_space<vmem>>, %arg7: memref<32x16x128xf32, #tpu.memory_space<vmem>>, %arg8: memref<1x128xf32, #tpu.memory_space<vmem>>, %arg9: memref<1x128xf32, #tpu.memory_space<vmem>>, %arg10: memref<1x128xf32, #tpu.memory_space<vmem>>, %arg11: memref<1x128xf32, #tpu.memory_space<vmem>>) attributes {dimension_semantics = [#tpu.dimension_semantics<parallel>, #tpu.dimension_semantics<arbitrary>], iteration_bounds = array<i64: 1, 4>, scalar_prefetch = 0 : i64, scratch_operands = 5 : i64, tpu.core_type = #tpu.core_type<tc>, window_params = [{transform_indices = @transform_0, window_bounds = array<i64: 1, 18, 18, 4>}, {transform_indices = @transform_1, window_bounds = array<i64: 9, 4, 128>}, {transform_indices = @transform_2, window_bounds = array<i64: 1, 128>}, {transform_indices = @transform_3, window_bounds = array<i64: 1, 128>}, {transform_indices = @transform_4, window_bounds = array<i64: 1, 16, 16, 128>}]} {
    %c0_i32 = arith.constant 0 : i32
    %0 = arith.cmpi eq, %arg1, %c0_i32 : i32
    %1 = arith.extui %0 : i1 to i32
    %c0_i32_0 = arith.constant 0 : i32
    %2 = arith.cmpi ne, %1, %c0_i32_0 : i32
    scf.if %2 {
      %cst = arith.constant 0.000000e+00 : f32
      %12 = vector.broadcast %cst : f32 to vector<1x128xf32>
      %c0 = arith.constant 0 : index
      %c0_5 = arith.constant 0 : index
      %13 = vector.load %arg8[%c0, %c0_5] : memref<1x128xf32, #tpu.memory_space<vmem>>, vector<1x128xf32>
      tpu.vector_store %arg8[%c0, %c0_5], %12 {strides = array<i32>} : memref<1x128xf32, #tpu.memory_space<vmem>>, vector<1x128xf32>,
      %cst_6 = arith.constant 0.000000e+00 : f32
      %14 = vector.broadcast %cst_6 : f32 to vector<1x128xf32>
      %c0_7 = arith.constant 0 : index
      %c0_8 = arith.constant 0 : index
      %15 = vector.load %arg9[%c0_7, %c0_8] : memref<1x128xf32, #tpu.memory_space<vmem>>, vector<1x128xf32>
      tpu.vector_store %arg9[%c0_7, %c0_8], %14 {strides = array<i32>} : memref<1x128xf32, #tpu.memory_space<vmem>>, vector<1x128xf32>,
    } else {
    }
    %c2_i32 = arith.constant 2 : i32
    %3 = arith.cmpi slt, %arg1, %c2_i32 : i32
    %4 = arith.extui %3 : i1 to i32
    %c0_i32_1 = arith.constant 0 : i32
    %5 = arith.cmpi ne, %4, %c0_i32_1 : i32
    scf.if %5 {
      %cst = arith.constant 0.000000e+00 : f32
      %12 = vector.broadcast %cst : f32 to vector<1x128xf32>
      %c0_i32_5 = arith.constant 0 : i32
      %c16_i32 = arith.constant 16 : i32
      %13 = arith.addi %c0_i32_5, %c16_i32 : i32
      %c1_i32_6 = arith.constant 1 : i32
      %14:2 = scf.for %arg12 = %c0_i32_5 to %13 step %c1_i32_6 iter_args(%arg13 = %12, %arg14 = %12) -> (vector<1x128xf32>, vector<1x128xf32>)  : i32 {
        %cst_15 = arith.constant 0.000000e+00 : f32
        %21 = vector.broadcast %cst_15 : f32 to vector<16x128xf32>
        %c0_i32_16 = arith.constant 0 : i32
        %22 = arith.addi %arg12, %c0_i32_16 : i32
        %c0_17 = arith.constant 0 : index
        %23 = arith.index_cast %22 : i32 to index
        %c0_18 = arith.constant 0 : index
        %c0_19 = arith.constant 0 : index
        %24 = vector.load %arg2[%c0_17, %23, %c0_18, %c0_19] : memref<1x18x18x4xbf16, #tpu.memory_space<vmem>>, vector<1x1x16x4xbf16>
        %25 = vector.shape_cast %24 : vector<1x1x16x4xbf16> to vector<16x4xbf16>
        %c0_20 = arith.constant 0 : index
        %c0_21 = arith.constant 0 : index
        %c0_22 = arith.constant 0 : index
        %26 = vector.load %arg3[%c0_20, %c0_21, %c0_22] : memref<9x4x128xbf16, #tpu.memory_space<vmem>>, vector<1x4x128xbf16>
        %27 = vector.shape_cast %26 : vector<1x4x128xbf16> to vector<4x128xbf16>
        %cst_23 = arith.constant dense<0.000000e+00> : vector<16x128xf32>
        %28 = tpu.matmul %25, %27, %cst_23 {dimension_numbers = #tpu.dot_dimension_numbers<[1], [0], [0], [1], [0, 0, 1, 1], [], []>} : vector<16x4xbf16>, vector<4x128xbf16>, vector<16x128xf32> -> vector<16x128xf32>
        %29 = arith.addf %21, %28 : vector<16x128xf32>
        %c0_i32_24 = arith.constant 0 : i32
        %30 = arith.addi %arg12, %c0_i32_24 : i32
        %c0_25 = arith.constant 0 : index
        %31 = arith.index_cast %30 : i32 to index
        %c1 = arith.constant 1 : index
        %c0_26 = arith.constant 0 : index
        %32 = vector.load %arg2[%c0_25, %31, %c1, %c0_26] : memref<1x18x18x4xbf16, #tpu.memory_space<vmem>>, vector<1x1x16x4xbf16>
        %33 = vector.shape_cast %32 : vector<1x1x16x4xbf16> to vector<16x4xbf16>
        %c1_27 = arith.constant 1 : index
        %c0_28 = arith.constant 0 : index
        %c0_29 = arith.constant 0 : index
        %34 = vector.load %arg3[%c1_27, %c0_28, %c0_29] : memref<9x4x128xbf16, #tpu.memory_space<vmem>>, vector<1x4x128xbf16>
        %35 = vector.shape_cast %34 : vector<1x4x128xbf16> to vector<4x128xbf16>
        %cst_30 = arith.constant dense<0.000000e+00> : vector<16x128xf32>
        %36 = tpu.matmul %33, %35, %cst_30 {dimension_numbers = #tpu.dot_dimension_numbers<[1], [0], [0], [1], [0, 0, 1, 1], [], []>} : vector<16x4xbf16>, vector<4x128xbf16>, vector<16x128xf32> -> vector<16x128xf32>
        %37 = arith.addf %29, %36 : vector<16x128xf32>
        %c0_i32_31 = arith.constant 0 : i32
        %38 = arith.addi %arg12, %c0_i32_31 : i32
        %c0_32 = arith.constant 0 : index
        %39 = arith.index_cast %38 : i32 to index
        %c2 = arith.constant 2 : index
        %c0_33 = arith.constant 0 : index
        %40 = vector.load %arg2[%c0_32, %39, %c2, %c0_33] : memref<1x18x18x4xbf16, #tpu.memory_space<vmem>>, vector<1x1x16x4xbf16>
        %41 = vector.shape_cast %40 : vector<1x1x16x4xbf16> to vector<16x4xbf16>
        %c2_34 = arith.constant 2 : index
        %c0_35 = arith.constant 0 : index
        %c0_36 = arith.constant 0 : index
        %42 = vector.load %arg3[%c2_34, %c0_35, %c0_36] : memref<9x4x128xbf16, #tpu.memory_space<vmem>>, vector<1x4x128xbf16>
        %43 = vector.shape_cast %42 : vector<1x4x128xbf16> to vector<4x128xbf16>
        %cst_37 = arith.constant dense<0.000000e+00> : vector<16x128xf32>
        %44 = tpu.matmul %41, %43, %cst_37 {dimension_numbers = #tpu.dot_dimension_numbers<[1], [0], [0], [1], [0, 0, 1, 1], [], []>} : vector<16x4xbf16>, vector<4x128xbf16>, vector<16x128xf32> -> vector<16x128xf32>
        %45 = arith.addf %37, %44 : vector<16x128xf32>
        %c1_i32_38 = arith.constant 1 : i32
        %46 = arith.addi %arg12, %c1_i32_38 : i32
        %c0_39 = arith.constant 0 : index
        %47 = arith.index_cast %46 : i32 to index
        %c0_40 = arith.constant 0 : index
        %c0_41 = arith.constant 0 : index
        %48 = vector.load %arg2[%c0_39, %47, %c0_40, %c0_41] : memref<1x18x18x4xbf16, #tpu.memory_space<vmem>>, vector<1x1x16x4xbf16>
        %49 = vector.shape_cast %48 : vector<1x1x16x4xbf16> to vector<16x4xbf16>
        %c3 = arith.constant 3 : index
        %c0_42 = arith.constant 0 : index
        %c0_43 = arith.constant 0 : index
        %50 = vector.load %arg3[%c3, %c0_42, %c0_43] : memref<9x4x128xbf16, #tpu.memory_space<vmem>>, vector<1x4x128xbf16>
        %51 = vector.shape_cast %50 : vector<1x4x128xbf16> to vector<4x128xbf16>
        %cst_44 = arith.constant dense<0.000000e+00> : vector<16x128xf32>
        %52 = tpu.matmul %49, %51, %cst_44 {dimension_numbers = #tpu.dot_dimension_numbers<[1], [0], [0], [1], [0, 0, 1, 1], [], []>} : vector<16x4xbf16>, vector<4x128xbf16>, vector<16x128xf32> -> vector<16x128xf32>
        %53 = arith.addf %45, %52 : vector<16x128xf32>
        %c1_i32_45 = arith.constant 1 : i32
        %54 = arith.addi %arg12, %c1_i32_45 : i32
        %c0_46 = arith.constant 0 : index
        %55 = arith.index_cast %54 : i32 to index
        %c1_47 = arith.constant 1 : index
        %c0_48 = arith.constant 0 : index
        %56 = vector.load %arg2[%c0_46, %55, %c1_47, %c0_48] : memref<1x18x18x4xbf16, #tpu.memory_space<vmem>>, vector<1x1x16x4xbf16>
        %57 = vector.shape_cast %56 : vector<1x1x16x4xbf16> to vector<16x4xbf16>
        %c4 = arith.constant 4 : index
        %c0_49 = arith.constant 0 : index
        %c0_50 = arith.constant 0 : index
        %58 = vector.load %arg3[%c4, %c0_49, %c0_50] : memref<9x4x128xbf16, #tpu.memory_space<vmem>>, vector<1x4x128xbf16>
        %59 = vector.shape_cast %58 : vector<1x4x128xbf16> to vector<4x128xbf16>
        %cst_51 = arith.constant dense<0.000000e+00> : vector<16x128xf32>
        %60 = tpu.matmul %57, %59, %cst_51 {dimension_numbers = #tpu.dot_dimension_numbers<[1], [0], [0], [1], [0, 0, 1, 1], [], []>} : vector<16x4xbf16>, vector<4x128xbf16>, vector<16x128xf32> -> vector<16x128xf32>
        %61 = arith.addf %53, %60 : vector<16x128xf32>
        %c1_i32_52 = arith.constant 1 : i32
        %62 = arith.addi %arg12, %c1_i32_52 : i32
        %c0_53 = arith.constant 0 : index
        %63 = arith.index_cast %62 : i32 to index
        %c2_54 = arith.constant 2 : index
        %c0_55 = arith.constant 0 : index
        %64 = vector.load %arg2[%c0_53, %63, %c2_54, %c0_55] : memref<1x18x18x4xbf16, #tpu.memory_space<vmem>>, vector<1x1x16x4xbf16>
        %65 = vector.shape_cast %64 : vector<1x1x16x4xbf16> to vector<16x4xbf16>
        %c5 = arith.constant 5 : index
        %c0_56 = arith.constant 0 : index
        %c0_57 = arith.constant 0 : index
        %66 = vector.load %arg3[%c5, %c0_56, %c0_57] : memref<9x4x128xbf16, #tpu.memory_space<vmem>>, vector<1x4x128xbf16>
        %67 = vector.shape_cast %66 : vector<1x4x128xbf16> to vector<4x128xbf16>
        %cst_58 = arith.constant dense<0.000000e+00> : vector<16x128xf32>
        %68 = tpu.matmul %65, %67, %cst_58 {dimension_numbers = #tpu.dot_dimension_numbers<[1], [0], [0], [1], [0, 0, 1, 1], [], []>} : vector<16x4xbf16>, vector<4x128xbf16>, vector<16x128xf32> -> vector<16x128xf32>
        %69 = arith.addf %61, %68 : vector<16x128xf32>
        %c2_i32_59 = arith.constant 2 : i32
        %70 = arith.addi %arg12, %c2_i32_59 : i32
        %c0_60 = arith.constant 0 : index
        %71 = arith.index_cast %70 : i32 to index
        %c0_61 = arith.constant 0 : index
        %c0_62 = arith.constant 0 : index
        %72 = vector.load %arg2[%c0_60, %71, %c0_61, %c0_62] : memref<1x18x18x4xbf16, #tpu.memory_space<vmem>>, vector<1x1x16x4xbf16>
        %73 = vector.shape_cast %72 : vector<1x1x16x4xbf16> to vector<16x4xbf16>
        %c6 = arith.constant 6 : index
        %c0_63 = arith.constant 0 : index
        %c0_64 = arith.constant 0 : index
        %74 = vector.load %arg3[%c6, %c0_63, %c0_64] : memref<9x4x128xbf16, #tpu.memory_space<vmem>>, vector<1x4x128xbf16>
        %75 = vector.shape_cast %74 : vector<1x4x128xbf16> to vector<4x128xbf16>
        %cst_65 = arith.constant dense<0.000000e+00> : vector<16x128xf32>
        %76 = tpu.matmul %73, %75, %cst_65 {dimension_numbers = #tpu.dot_dimension_numbers<[1], [0], [0], [1], [0, 0, 1, 1], [], []>} : vector<16x4xbf16>, vector<4x128xbf16>, vector<16x128xf32> -> vector<16x128xf32>
        %77 = arith.addf %69, %76 : vector<16x128xf32>
        %c2_i32_66 = arith.constant 2 : i32
        %78 = arith.addi %arg12, %c2_i32_66 : i32
        %c0_67 = arith.constant 0 : index
        %79 = arith.index_cast %78 : i32 to index
        %c1_68 = arith.constant 1 : index
        %c0_69 = arith.constant 0 : index
        %80 = vector.load %arg2[%c0_67, %79, %c1_68, %c0_69] : memref<1x18x18x4xbf16, #tpu.memory_space<vmem>>, vector<1x1x16x4xbf16>
        %81 = vector.shape_cast %80 : vector<1x1x16x4xbf16> to vector<16x4xbf16>
        %c7 = arith.constant 7 : index
        %c0_70 = arith.constant 0 : index
        %c0_71 = arith.constant 0 : index
        %82 = vector.load %arg3[%c7, %c0_70, %c0_71] : memref<9x4x128xbf16, #tpu.memory_space<vmem>>, vector<1x4x128xbf16>
        %83 = vector.shape_cast %82 : vector<1x4x128xbf16> to vector<4x128xbf16>
        %cst_72 = arith.constant dense<0.000000e+00> : vector<16x128xf32>
        %84 = tpu.matmul %81, %83, %cst_72 {dimension_numbers = #tpu.dot_dimension_numbers<[1], [0], [0], [1], [0, 0, 1, 1], [], []>} : vector<16x4xbf16>, vector<4x128xbf16>, vector<16x128xf32> -> vector<16x128xf32>
        %85 = arith.addf %77, %84 : vector<16x128xf32>
        %c2_i32_73 = arith.constant 2 : i32
        %86 = arith.addi %arg12, %c2_i32_73 : i32
        %c0_74 = arith.constant 0 : index
        %87 = arith.index_cast %86 : i32 to index
        %c2_75 = arith.constant 2 : index
        %c0_76 = arith.constant 0 : index
        %88 = vector.load %arg2[%c0_74, %87, %c2_75, %c0_76] : memref<1x18x18x4xbf16, #tpu.memory_space<vmem>>, vector<1x1x16x4xbf16>
        %89 = vector.shape_cast %88 : vector<1x1x16x4xbf16> to vector<16x4xbf16>
        %c8 = arith.constant 8 : index
        %c0_77 = arith.constant 0 : index
        %c0_78 = arith.constant 0 : index
        %90 = vector.load %arg3[%c8, %c0_77, %c0_78] : memref<9x4x128xbf16, #tpu.memory_space<vmem>>, vector<1x4x128xbf16>
        %91 = vector.shape_cast %90 : vector<1x4x128xbf16> to vector<4x128xbf16>
        %cst_79 = arith.constant dense<0.000000e+00> : vector<16x128xf32>
        %92 = tpu.matmul %89, %91, %cst_79 {dimension_numbers = #tpu.dot_dimension_numbers<[1], [0], [0], [1], [0, 0, 1, 1], [], []>} : vector<16x4xbf16>, vector<4x128xbf16>, vector<16x128xf32> -> vector<16x128xf32>
        %93 = arith.addf %85, %92 : vector<16x128xf32>
        %c16_i32_80 = arith.constant 16 : i32
        %94 = arith.muli %arg1, %c16_i32_80 : i32
        %95 = arith.addi %94, %arg12 : i32
        %96 = arith.index_cast %95 : i32 to index
        %c0_81 = arith.constant 0 : index
        %c0_82 = arith.constant 0 : index
        %97 = vector.load %arg7[%96, %c0_81, %c0_82] : memref<32x16x128xf32, #tpu.memory_space<vmem>>, vector<1x16x128xf32>
        %98 = vector.shape_cast %97 : vector<1x16x128xf32> to vector<16x128xf32>
        %99 = vector.shape_cast %93 : vector<16x128xf32> to vector<1x16x128xf32>
        tpu.vector_store %arg7[%96, %c0_81, %c0_82], %99 {strides = array<i32>} : memref<32x16x128xf32, #tpu.memory_space<vmem>>, vector<1x16x128xf32>,
        %cst_83 = arith.constant dense<0.000000e+00> : vector<128xf32>
        %100 = vector.multi_reduction <add>, %93, %cst_83 [0] : vector<16x128xf32> to vector<128xf32>
        %101 = vector.shape_cast %100 : vector<128xf32> to vector<1x128xf32>
        %102 = arith.addf %arg13, %101 : vector<1x128xf32>
        %103 = arith.mulf %93, %93 : vector<16x128xf32>
        %cst_84 = arith.constant dense<0.000000e+00> : vector<128xf32>
        %104 = vector.multi_reduction <add>, %103, %cst_84 [0] : vector<16x128xf32> to vector<128xf32>
        %105 = vector.shape_cast %104 : vector<128xf32> to vector<1x128xf32>
        %106 = arith.addf %arg14, %105 : vector<1x128xf32>
        scf.yield %102, %106 : vector<1x128xf32>, vector<1x128xf32>
      }
      %c16_i32_7 = arith.constant 16 : i32
      %c0 = arith.constant 0 : index
      %c0_8 = arith.constant 0 : index
      %15 = vector.load %arg8[%c0, %c0_8] : memref<1x128xf32, #tpu.memory_space<vmem>>, vector<1x128xf32>
      %16 = arith.addf %15, %14#0 : vector<1x128xf32>
      %c0_9 = arith.constant 0 : index
      %c0_10 = arith.constant 0 : index
      %17 = vector.load %arg8[%c0_9, %c0_10] : memref<1x128xf32, #tpu.memory_space<vmem>>, vector<1x128xf32>
      tpu.vector_store %arg8[%c0_9, %c0_10], %16 {strides = array<i32>} : memref<1x128xf32, #tpu.memory_space<vmem>>, vector<1x128xf32>,
      %c0_11 = arith.constant 0 : index
      %c0_12 = arith.constant 0 : index
      %18 = vector.load %arg9[%c0_11, %c0_12] : memref<1x128xf32, #tpu.memory_space<vmem>>, vector<1x128xf32>
      %19 = arith.addf %18, %14#1 : vector<1x128xf32>
      %c0_13 = arith.constant 0 : index
      %c0_14 = arith.constant 0 : index
      %20 = vector.load %arg9[%c0_13, %c0_14] : memref<1x128xf32, #tpu.memory_space<vmem>>, vector<1x128xf32>
      tpu.vector_store %arg9[%c0_13, %c0_14], %19 {strides = array<i32>} : memref<1x128xf32, #tpu.memory_space<vmem>>, vector<1x128xf32>,
    } else {
    }
    %c1_i32 = arith.constant 1 : i32
    %6 = arith.cmpi eq, %arg1, %c1_i32 : i32
    %7 = arith.extui %6 : i1 to i32
    %c0_i32_2 = arith.constant 0 : i32
    %8 = arith.cmpi ne, %7, %c0_i32_2 : i32
    scf.if %8 {
      %c0 = arith.constant 0 : index
      %c0_5 = arith.constant 0 : index
      %12 = vector.load %arg8[%c0, %c0_5] : memref<1x128xf32, #tpu.memory_space<vmem>>, vector<1x128xf32>
      %cst = arith.constant 0.001953125 : f32
      %13 = vector.broadcast %cst : f32 to vector<1x128xf32>
      %14 = arith.mulf %12, %13 : vector<1x128xf32>
      %c0_6 = arith.constant 0 : index
      %c0_7 = arith.constant 0 : index
      %15 = vector.load %arg9[%c0_6, %c0_7] : memref<1x128xf32, #tpu.memory_space<vmem>>, vector<1x128xf32>
      %cst_8 = arith.constant 0.001953125 : f32
      %16 = vector.broadcast %cst_8 : f32 to vector<1x128xf32>
      %17 = arith.mulf %15, %16 : vector<1x128xf32>
      %18 = arith.mulf %14, %14 : vector<1x128xf32>
      %19 = arith.subf %17, %18 : vector<1x128xf32>
      %cst_9 = arith.constant 0.000000e+00 : f32
      %20 = vector.broadcast %cst_9 : f32 to vector<1x128xf32>
      %21 = arith.maximumf %19, %20 : vector<1x128xf32>
      %cst_10 = arith.constant 9.99999974E-6 : f32
      %22 = vector.broadcast %cst_10 : f32 to vector<1x128xf32>
      %23 = arith.addf %21, %22 : vector<1x128xf32>
      %24 = math.rsqrt %23 : vector<1x128xf32>
      %c0_11 = arith.constant 0 : index
      %c0_12 = arith.constant 0 : index
      %25 = vector.load %arg4[%c0_11, %c0_12] : memref<1x128xf32, #tpu.memory_space<vmem>>, vector<1x128xf32>
      %26 = arith.mulf %25, %24 : vector<1x128xf32>
      %c0_13 = arith.constant 0 : index
      %c0_14 = arith.constant 0 : index
      %27 = vector.load %arg10[%c0_13, %c0_14] : memref<1x128xf32, #tpu.memory_space<vmem>>, vector<1x128xf32>
      tpu.vector_store %arg10[%c0_13, %c0_14], %26 {strides = array<i32>} : memref<1x128xf32, #tpu.memory_space<vmem>>, vector<1x128xf32>,
      %c0_15 = arith.constant 0 : index
      %c0_16 = arith.constant 0 : index
      %28 = vector.load %arg5[%c0_15, %c0_16] : memref<1x128xf32, #tpu.memory_space<vmem>>, vector<1x128xf32>
      %29 = arith.mulf %14, %26 : vector<1x128xf32>
      %30 = arith.subf %28, %29 : vector<1x128xf32>
      %c0_17 = arith.constant 0 : index
      %c0_18 = arith.constant 0 : index
      %31 = vector.load %arg11[%c0_17, %c0_18] : memref<1x128xf32, #tpu.memory_space<vmem>>, vector<1x128xf32>
      tpu.vector_store %arg11[%c0_17, %c0_18], %30 {strides = array<i32>} : memref<1x128xf32, #tpu.memory_space<vmem>>, vector<1x128xf32>,
    } else {
    }
    %c2_i32_3 = arith.constant 2 : i32
    %9 = arith.cmpi sge, %arg1, %c2_i32_3 : i32
    %10 = arith.extui %9 : i1 to i32
    %c0_i32_4 = arith.constant 0 : i32
    %11 = arith.cmpi ne, %10, %c0_i32_4 : i32
    scf.if %11 {
      %c2_i32_5 = arith.constant 2 : i32
      %12 = arith.subi %arg1, %c2_i32_5 : i32
      %c16_i32 = arith.constant 16 : i32
      %13 = arith.muli %12, %c16_i32 : i32
      %14 = arith.index_cast %13 : i32 to index
      %c0 = arith.constant 0 : index
      %c0_6 = arith.constant 0 : index
      %15 = vector.load %arg7[%14, %c0, %c0_6] : memref<32x16x128xf32, #tpu.memory_space<vmem>>, vector<16x16x128xf32>
      %c0_7 = arith.constant 0 : index
      %c0_8 = arith.constant 0 : index
      %16 = vector.load %arg10[%c0_7, %c0_8] : memref<1x128xf32, #tpu.memory_space<vmem>>, vector<1x128xf32>
      %17 = vector.shape_cast %16 : vector<1x128xf32> to vector<1x1x128xf32>
      %18 = vector.broadcast %17 : vector<1x1x128xf32> to vector<16x16x128xf32>
      %19 = arith.mulf %15, %18 : vector<16x16x128xf32>
      %c0_9 = arith.constant 0 : index
      %c0_10 = arith.constant 0 : index
      %20 = vector.load %arg11[%c0_9, %c0_10] : memref<1x128xf32, #tpu.memory_space<vmem>>, vector<1x128xf32>
      %21 = vector.shape_cast %20 : vector<1x128xf32> to vector<1x1x128xf32>
      %22 = vector.broadcast %21 : vector<1x1x128xf32> to vector<16x16x128xf32>
      %23 = arith.addf %19, %22 : vector<16x16x128xf32>
      %cst = arith.constant 0.000000e+00 : f32
      %24 = vector.broadcast %cst : f32 to vector<16x16x128xf32>
      %25 = arith.maximumf %23, %24 : vector<16x16x128xf32>
      %c0_11 = arith.constant 0 : index
      %c0_12 = arith.constant 0 : index
      %c0_13 = arith.constant 0 : index
      %c0_14 = arith.constant 0 : index
      %26 = vector.load %arg6[%c0_11, %c0_12, %c0_13, %c0_14] : memref<1x16x16x128xf32, #tpu.memory_space<vmem>>, vector<1x16x16x128xf32>
      %27 = vector.shape_cast %26 : vector<1x16x16x128xf32> to vector<16x16x128xf32>
      %28 = vector.shape_cast %25 : vector<16x16x128xf32> to vector<1x16x16x128xf32>
      tpu.vector_store %arg6[%c0_11, %c0_12, %c0_13, %c0_14], %28 {strides = array<i32>} : memref<1x16x16x128xf32, #tpu.memory_space<vmem>>, vector<1x16x16x128xf32>,
    } else {
    }
    return
  }
  func.func @transform_0(%arg0: i32, %arg1: i32) -> (i32, i32, i32, i32) {
    %c1_i32 = arith.constant 1 : i32
    %0 = arith.minsi %arg1, %c1_i32 : i32
    %c0_i32 = arith.constant 0 : i32
    %c0_i32_0 = arith.constant 0 : i32
    %c0_i32_1 = arith.constant 0 : i32
    %c0_i32_2 = arith.constant 0 : i32
    return %0, %c0_i32, %c0_i32_0, %c0_i32_1 : i32, i32, i32, i32
  }
  func.func @transform_1(%arg0: i32, %arg1: i32) -> (i32, i32, i32) {
    %c0_i32 = arith.constant 0 : i32
    %c0_i32_0 = arith.constant 0 : i32
    %c0_i32_1 = arith.constant 0 : i32
    return %c0_i32, %c0_i32_0, %arg0 : i32, i32, i32
  }
  func.func @transform_2(%arg0: i32, %arg1: i32) -> (i32, i32) {
    %c0_i32 = arith.constant 0 : i32
    %c0_i32_0 = arith.constant 0 : i32
    return %c0_i32, %arg0 : i32, i32
  }
  func.func @transform_3(%arg0: i32, %arg1: i32) -> (i32, i32) {
    %c0_i32 = arith.constant 0 : i32
    %c0_i32_0 = arith.constant 0 : i32
    return %c0_i32, %arg0 : i32, i32
  }
  func.func @transform_4(%arg0: i32, %arg1: i32) -> (i32, i32, i32, i32) {
    %c2_i32 = arith.constant 2 : i32
    %0 = arith.subi %arg1, %c2_i32 : i32
    %c0_i32 = arith.constant 0 : i32
    %1 = arith.maxsi %0, %c0_i32 : i32
    %c0_i32_0 = arith.constant 0 : i32
    %c0_i32_1 = arith.constant 0 : i32
    %c0_i32_2 = arith.constant 0 : i32
    return %1, %c0_i32_0, %c0_i32_1, %arg0 : i32, i32, i32, i32
  }
}

</mosaic_0001>

<bundles_post_ra>
// kernel: conv_unit_forward.1
= control target key start
LH: loop header
LB: loop body
LE: loop exit
PB: predicated region body
PF: predicated region fallthrough
CT: control target
= control target key end

     0   :  { %s1590_s15 = smov 0   ;;  %s1592_s16 = smov 0   ;;  %s1904_s0 = inlined_call_operand.vmem [shape: bf16[2,18,18,4], index: 0, kind: input, shape index: {}]   ;;  %s1905_s1 = inlined_call_operand.vmem [shape: bf16[9,4,128], index: 1, kind: input, shape index: {}]   ;;  %s1906_s2 = inlined_call_operand.vmem [shape: f32[1,128], index: 2, kind: input, shape index: {}]   ;;  %s1907_s3 = inlined_call_operand.vmem [shape: f32[1,128], index: 3, kind: input, shape index: {}]   ;;  %s1908_s4 = inlined_call_operand.vmem [shape: f32[2,16,16,128], index: 4, kind: output, shape index: {}]  }
   0x1   :  { %s1594_s17 = smov 0  }
   0x2 LB: > { %s23_s18 = sadd.s32 1, %s1544_s16  ;;  %p1275_p0 = scmp.ge.s32.totalorder %s1548_s17, 1  ;;  %s1548_s17 = sphi %s1594_s17, %s14_s17   ;;  %s1544_s16 = sphi %s1592_s16, %s1912_s16   ;;  %s1540_s15 = sphi %s1590_s15, %s1911_s15  }
   0x3   : > { %p24_p1 = scmp.ge.s32.totalorder %s23_s18, 4  ;;  %p215_p2 = scmp.lt.s32.totalorder %s1548_s17, 5 }
   0x5   : > { %s1914_s18 = smov (%p24_p1, %s23_s18), 0  ;;  %p216_p3 = pnand %p1275_p0, %p215_p2 }
   0x6   : > { %p259_p4 = scmp.lt.s32.totalorder (!%p216_p3), %s1540_s15, 1  ;;  %s1612_s19 = sadd.s32 (!%p216_p3), 4294967294, %s1540_s15 }
   0x7   : > { %219 = sbr.rel (%p216_p3) target bundleno = 400 (0x190), region = 36  ;;  %p279_p5 = scmp.gt.s32.totalorder (!%p216_p3), %s1612_s19, 0 }
   0x8   : > { %p1281_p6 = scmp.lt.s32.totalorder (!%p216_p3), %s1612_s19, 1  ;;  %p1288_p7 = scmp.ne.s32.totalorder (!%p216_p3), %s1540_s15, 0 }
   0xe   : > { %s260_s20 = scalar_select %p259_p4, %s1540_s15, 1 }
   0xf   : > { %s280_s21 = scalar_select %p279_p5, %s1612_s19, 0 }
  0x10   : > { %s1916_s20 = smov (!%p259_p4, %s260_s20), 1  ;;  %296 = sbr.rel (%p1288_p7) target bundleno = 23 (0x17), region = 40 }
  0x11   : > { %s1918_s21 = smov (!%p1281_p6, %s280_s21), 1  ;;  %s1449_s22 = smul.u32 216, %s1916_s20  ;;  %v1562_v0 = vmov (!%p1288_p7), 0.0  }
  0x12   : > { %s1344_s23 = sshll.u32 %s1918_s21, 8  ;;  %297 = vst [vmem:[#allocation3] sm:$0x1] (!%p1288_p7), %v1562_v0  ;;  %298 = vst [vmem:[#allocation4] sm:$0x1] (!%p1288_p7), %v1562_v0 }
  0x13   : > { %s1621_s26 = scalar_lea.vmem %s1904_s0, %s1449_s22  ;;  %s1626_s29 = scalar_lea.vmem %s1908_s4, %s1344_s23 }
  0x17 PF: > { %p1289_p8 = scmp.ge.s32.totalorder %s1540_s15, 2 }
  0x18   : > { %v1630_v1 = vmov (!%p1289_p8), 0.0   ;;  %v1632_v2 = vmov (!%p1289_p8), 0.0   ;;  %s1634_s30 = smov (!%p1289_p8), 0  }
  0x19   : > { %302 = sbr.rel (%p1289_p8) target bundleno = 333 (0x14d), region = 44 }
  0x20 LB: >> { %vm345_vm0 = vcmask 1041408   ;;  %v1307_v3 = vld [vmem:[%s1905_s1 + $0x8] sm:$0x3]  ;;  %v1291_v4 = vld [vmem:[%s1905_s1 + $0x2] sm:$0x3]  ;;  %v1563_v5 = vmov 0.0   ;;  %s1560_s30 = sphi %s1634_s30, %s308_s30   ;;  %v1556_v2 = vphi %v1632_v2, %v1910_v2   ;;  %v1552_v1 = vphi %v1630_v1, %v1909_v1  }
  0x21   : >> { %1389 = vmatprep.subr.bf16.mxu0 %v1563_v5  ;;  %1365 = vmatprep.subr.bf16.mxu1 %v1563_v5  ;;  %v586_v6 = vsel %vm345_vm0, %v1307_v3, 0  ;;  %v347_v7 = vsel %vm345_vm0, %v1291_v4, 0  ;;  %s1345_s9 = smul.u32 12, %s1560_s30  ;;  %vm1564_vm1 = vmmov 0   ;;  %v316_v19 = vld [vmem:[%s1905_s1] sm:$0x3] }
  0x22   : >> { %1390 = vmatpush3.bf16.msra.mxu0 %v586_v6  ;;  %1366 = vmatpush3.bf16.msra.mxu1 %v347_v7  ;;  %vm328_vm2 = vsmask.f32 7424  ;;  %vm341_vm3 = vcmask 31744   ;;  %v1312_v27 = vld [vmem:[%s1905_s1 + $0xa] sm:$0x3]  ;;  %v393_v29 = vsel %vm345_vm0, %v316_v19, 0 }
  0x23   : >> { %1367 = vmatprep.mubr.msk.bf16.mxu1 %vm1564_vm1, %v1563_v5  ;;  %1391 = vmatprep.mubr.msk.bf16.mxu0 %vm1564_vm1, %v1563_v5  ;;  %s1662_s10 = scalar_lea.vmem %s1621_s26, %s1345_s9  ;;  %v644_v32 = vsel %vm345_vm0, %v1312_v27, 0  ;;  %v1296_v38 = vld [vmem:[%s1905_s1 + $0x4] sm:$0x3]  ;;  %vm442_vm4 = vcmask 1046528   ;;  %v1317_v39 = vld [vmem:[%s1905_s1 + $0xc] sm:$0x3] }
  0x24   : >> { %1395 = vmatprep.subr.bf16.mxu0 %v1563_v5  ;;  %1371 = vmatprep.subr.bf16.mxu1 %v1563_v5  ;;  %v314_v8 = vld [vmem:[%s1662_s10] sm:$0xf]  ;;  %v315_v9 = vld [vmem:[%s1662_s10 + $0x4] sm:$0xf]  ;;  %v1304_v12 = vld [vmem:[%s1662_s10 + $0xc] sm:$0xf] }
  0x25   : >> { %v1292_v10 = vcombine.low %v314_v8, %v315_v9  ;;  %v1502_v11 = vld [vmem:[%s1662_s10 + $0x8] ss:$0 sps:$4 sm:$0x11]   ;;  %v1305_v13 = vld [vmem:[%s1662_s10 + $0x10] sm:$0xf]  ;;  %v450_v40 = vsel %vm345_vm0, %v1296_v38, 0 }
  0x26   : >> { %v337_v16 = vshll.u32 %v1502_v11, 16  ;;  %v1308_v17 = vcombine.low %v1304_v12, %v1305_v13  ;;  %v1504_v18 = vld [vmem:[%s1662_s10 + $0x14] ss:$0 sps:$4 sm:$0x11]   ;;  %v1311_v33 = vld [vmem:[%s1662_s10 + $0xc] sm:$0xe] }
  0x27   : >> { %v330_v14 = vshrl.u32 %v1292_v10, 16  ;;  %v332_v15 = vshll.u32 %v1292_v10, 16  ;;  %v578_v24 = vshll.u32 %v1504_v18, 16  ;;  %v1313_v35 = vcombine.low %v1311_v33, %v1305_v13  ;;  %v436_v41 = vld [vmem:[%s1662_s10] sm:$0xe]  ;;  %v1507_v53 = vld [vmem:[%s1662_s10 + $0x18] sm:$0xff]  }
  0x28   : >> { %v339_v21 = vrot.slane %v337_v16, 1  ;;  %v571_v22 = vshrl.u32 %v1308_v17, 16  ;;  %v573_v23 = vshll.u32 %v1308_v17, 16  ;;  %v638_v37 = vrot.slane %v1504_v18, 1  ;;  %v1320_v45 = vld [vmem:[%s1662_s10 + $0x18] sm:$0xf] }
  0x29   : >> { %v334_v20 = vrot.slane %v332_v15, 1  ;;  %v580_v28 = vrot.slane %v578_v24, 1  ;;  %v637_v36 = vrot.slane %v1313_v35, 1  ;;  %v706_v43 = vsel %vm345_vm0, %v1317_v39, 0  ;;  %v1321_v46 = vld [vmem:[%s1662_s10 + $0x1c] sm:$0xf] }
  0x2a   : >> { %v575_v26 = vrot.slane %v573_v23, 1  ;;  %v1297_v44 = vcombine.low %v436_v41, %v315_v9  ;;  %v444_v48 = vrot.slane %v1502_v11, 1  ;;  %v1301_v49 = vld [vmem:[%s1905_s1 + $0x6] sm:$0x3]  ;;  %v1324_v50 = vcombine.low %v1320_v45, %v1321_v46  ;;  %v1323_v52 = vld [vmem:[%s1905_s1 + $0xe] sm:$0x3] }
  0x2b   : >> { %v335_v25 = vor.u32 %v334_v20, %v330_v14  ;;  %v639_v42 = vsel %vm442_vm4, %v637_v36, %v638_v37  ;;  %v512_v54 = vsel %vm345_vm0, %v1301_v49, 0  ;;  %v1510_v55 = vld [vmem:[%s1662_s10 + $0x20] ss:$0 sps:$4 sm:$0x11]   ;;  %v780_v57 = vsel %vm345_vm0, %v1323_v52, 0  ;;  %v1508_v63 = vld [vmem:[%s1662_s10 + $0xc] sm:$0xff]  }
  0x2c   : >> { %v576_v31 = vor.u32 %v575_v26, %v571_v22  ;;  %v443_v47 = vrot.slane %v1297_v44, 1  ;;  %v767_v56 = vshll.u32 %v1324_v50, 16  ;;  %v765_v58 = vshrl.u32 %v1324_v50, 16  ;;  %v1328_v0 = vld [vmem:[%s1905_s1 + $0x10] sm:$0x3]  ;;  %s1331_s7 = sshll.u32 %s1540_s15, 4 }
  0x2d   : >> { %v340_v30 = vsel %vm328_vm2, %v335_v25, %v339_v21  ;;  %v772_v60 = vshll.u32 %v1510_v55, 16  ;;  %v838_v4 = vsel %vm345_vm0, %v1328_v0, 0  ;;  %v1327_v6 = vld [vmem:[%s1662_s10 + $0x18] sm:$0xe]  ;;  %v832_v9 = vrot.slane %v1510_v55, 1  ;;  %s884_s8 = sadd.s32 %s1560_s30, %s1331_s7  ;;  %s308_s30 = sadd.s32 1, %s1560_s30  }
  0x2e   : >> { %1368 = vmatmul.mubr.msk.bf16.vlgmr.msra.gmra.mrb[0].mxu1 %vm341_vm3, %v340_v30  ;;  %v581_v34 = vsel %vm328_vm2, %v576_v31, %v580_v28  ;;  %v445_v51 = vsel %vm442_vm4, %v443_v47, %v444_v48  ;;  %v769_v59 = vrot.slane %v767_v56, 1  ;;  %v1329_v7 = vcombine.low %v1327_v6, %v1321_v46  ;;  %s1332_s9 = sshll.u32 %s884_s8, 4  ;;  %p305_p9 = scmp.ge.s32.totalorder %s308_s30, 16  }
  0x2f   : >> { %1372 = vmatpush3.bf16.msra.mxu1 %v393_v29  ;;  %1373 = vmatprep.mubr.msk.bf16.mxu1 %vm1564_vm1, %v1563_v5  ;;  %v774_v62 = vrot.slane %v772_v60, 1  ;;  %s886_s10 = scalar_lea.vmem [#allocation2], %s1332_s9  ;;  %v907_v38 = vld [vmem:[#allocation3] sm:$0x1] (%p305_p9)  ;;  %v910_v39 = vld [vmem:[#allocation4] sm:$0x1] (%p305_p9) }
  0x30   : >> { %1392 = vmatmul.mubr.msk.bf16.vlgmr.msra.gmra.mrb[0].mxu0 %vm341_vm3, %v581_v34  ;;  %1377 = vmatprep.subr.bf16.mxu1 %v1563_v5  ;;  %v770_v61 = vor.u32 %v769_v59, %v765_v58  ;;  %v831_v8 = vrot.slane %v1329_v7, 1 }
  0x31   : >> { %1396 = vmatpush3.bf16.msra.mxu0 %v644_v32  ;;  %1397 = vmatprep.mubr.msk.bf16.mxu0 %vm1564_vm1, %v1563_v5 }
  0x32   : >> { %1401 = vmatprep.subr.bf16.mxu0 %v1563_v5  ;;  %v775_v3 = vsel %vm328_vm2, %v770_v61, %v774_v62 }
  0x3a   : >> { %1374 = vmatmul.mubr.msk.bf16.vlgmr.msra.gmra.mrb[0].mxu1 %vm341_vm3, %v1292_v10  ;;  %v833_v10 = vsel %vm442_vm4, %v831_v8, %v832_v9 }
  0x3b   : >> { %1378 = vmatpush3.bf16.msra.mxu1 %v450_v40  ;;  %1379 = vmatprep.mubr.msk.bf16.mxu1 %vm1564_vm1, %v1563_v5 }
  0x3c   : >> { %1398 = vmatmul.mubr.msk.bf16.vlgmr.msra.gmra.mrb[0].mxu0 %vm341_vm3, %v639_v42  ;;  %1383 = vmatprep.subr.bf16.mxu1 %v1563_v5 }
  0x3d   : >> { %1402 = vmatpush3.bf16.msra.mxu0 %v706_v43  ;;  %1403 = vmatprep.mubr.msk.bf16.mxu0 %vm1564_vm1, %v1563_v5 }
  0x3e   : >> { %1407 = vmatprep.subr.bf16.mxu0 %v1563_v5 }
  0x46   : >> { %1380 = vmatmul.mubr.msk.bf16.vlgmr.msra.gmra.mrb[0].mxu1 %vm341_vm3, %v445_v51 }
  0x47   : >> { %1384 = vmatpush3.bf16.msra.mxu1 %v512_v54  ;;  %1385 = vmatprep.mubr.msk.bf16.mxu1 %vm1564_vm1, %v1563_v5 }
  0x48   : >> { %1404 = vmatmul.mubr.msk.bf16.vlgmr.msra.gmra.mrb[0].mxu0 %vm341_vm3, %v1507_v53 }
  0x49   : >> { %1408 = vmatpush3.bf16.msra.mxu0 %v780_v57  ;;  %1409 = vmatprep.mubr.msk.bf16.mxu0 %vm1564_vm1, %v1563_v5 }
  0x4a   : >> { %1413 = vmatprep.subr.bf16.mxu0 %v1563_v5 }
  0x52   : >> { %1386 = vmatmul.mubr.msk.bf16.vlgmr.msra.gmra.mrb[0].mxu1 %vm341_vm3, %v1508_v63 }
  0x54   : >> { %1410 = vmatmul.mubr.msk.bf16.vlgmr.msra.gmra.mrb[0].mxu0 %vm341_vm3, %v775_v3 }
  0x55   : >> { %1414 = vmatpush3.bf16.msra.mxu0 %v838_v4  ;;  %1415 = vmatprep.mubr.msk.bf16.mxu0 %vm1564_vm1, %v1563_v5 }
  0x60   : >> { %1416 = vmatmul.mubr.msk.bf16.vlgmr.msra.gmra.mrb[0].mxu0 %vm341_vm3, %v833_v10 }
 0x125   : >> { %v548_v11 = vpop.f32.mrb[0].mxu1 }
 0x126   : >> { %v1387_v12 = vpop.f32.mrb[1].mxu1 }
 0x127   : >> { %v551_v13 = vpop.f32.mrb[2].mxu1 }
 0x128   : >> { %v1388_v14 = vpop.f32.mrb[3].mxu1 }
 0x133   : >> { %v874_v15 = vpop.f32.mrb[0].mxu0 }
 0x134   : >> { %v1419_v16 = vadd.f32 %v874_v15, %v548_v11  ;;  %v1417_v17 = vpop.f32.mrb[1].mxu0 }
 0x135   : >> { %v877_v18 = vpop.f32.mrb[2].mxu0 }
 0x136   : >> { %887 = vst [vmem:[%s886_s10] sm:$0xff] %v1419_v16  ;;  %v1420_v5 = vadd.f32 %v877_v18, %v551_v13  ;;  %v1418_v19 = vpop.f32.mrb[3].mxu0  ;;  %v897_v20 = vmul.f32 %v1419_v16, %v1419_v16 }
 0x138   : >> { %888 = vst [vmem:[%s886_s10 + $0x8] sm:$0xff] %v1420_v5  ;;  %v889_v21 = vadd.f32 %v1420_v5, %v1419_v16  ;;  %v898_v22 = vmul.f32 %v1420_v5, %v1420_v5 }
 0x13a   : >> { %v890_v23 = vrot.slane %v889_v21, 4  ;;  %v899_v24 = vadd.f32 %v898_v22, %v897_v20 }
 0x13c   : >> { %v891_v25 = vadd.f32 %v890_v23, %v889_v21  ;;  %v900_v26 = vrot.slane %v899_v24, 4 }
 0x13e   : >> { %v892_v27 = vrot.slane %v891_v25, 2  ;;  %v901_v28 = vadd.f32 %v900_v26, %v899_v24 }
 0x140   : >> { %v893_v29 = vadd.f32 %v892_v27, %v891_v25  ;;  %v902_v30 = vrot.slane %v901_v28, 2 }
 0x142   : >> { %v894_v31 = vrot.slane %v893_v29, 1  ;;  %v903_v32 = vadd.f32 %v902_v30, %v901_v28 }
 0x144   : >> { %v895_v33 = vadd.f32 %v894_v31, %v893_v29  ;;  %v904_v34 = vrot.slane %v903_v32, 1  ;;  %307 = sbr.rel (!%p305_p9) target bundleno = 32 (0x20), region = 111 }
 0x146   : >> { %v896_v35 = vadd.f32 %v1556_v2, %v895_v33   ;;  %v905_v36 = vadd.f32 %v904_v34, %v903_v32 }
 0x148   : >> { %v906_v37 = vadd.f32 %v1552_v1, %v905_v36   ;;  %v1910_v2 = vmov %v896_v35  ;;  %v908_v40 = vadd.f32 (%p305_p9), %v907_v38, %v896_v35 }
 0x14a   : >> { %v1909_v1 = vmov %v906_v37  ;;  %v911_v41 = vadd.f32 (%p305_p9), %v910_v39, %v906_v37  ;;  %909 = vst [vmem:[#allocation3] sm:$0x1] (%p305_p9), %v908_v40 }
 0x14c   : > { %912 = vst [vmem:[#allocation4] sm:$0x1] %v911_v41 }
 0x14d PF: > { %p1333_p10 = scmp.ne.s32.totalorder %s1540_s15, 1 }
 0x14e   : > { %v926_v1 = vld [vmem:[%s1906_s2] sm:$0x1] (!%p1333_p10) }
 0x14f   : > { %916 = sbr.rel (%p1333_p10) target bundleno = 366 (0x16e), region = 55  ;;  %v929_v51 = vld [vmem:[%s1907_s3] sm:$0x1] (!%p1333_p10) }
 0x151   : > { %v917_v2 = vld [vmem:[#allocation3] sm:$0x1] (!%p1333_p10) }
 0x152   : > { %v918_v43 = vmul.f32 (!%p1333_p10), 0.001953125, %v917_v2 }
 0x153   : > { %v919_v42 = vld [vmem:[#allocation4] sm:$0x1] (!%p1333_p10) }
 0x154   : > { %v920_v44 = vmul.f32 (!%p1333_p10), 0.001953125, %v919_v42  ;;  %v921_v45 = vmul.f32 (!%p1333_p10), %v918_v43, %v918_v43 }
 0x156   : > { %v922_v46 = vsub.f32 %v920_v44, %v921_v45 }
 0x158   : > { %v923_v47 = vmax.f32 %v922_v46, 0.0 }
 0x15a   : > { %v924_v48 = vadd.f32 1e-05, %v923_v47 }
 0x15c   : > { %1512 = vrsqrt.f32 %v924_v48 }
 0x166   : > { %v1513_v49 = vpop.eup %1512 }
 0x167   : > { %v927_v50 = vmul.f32 %v1513_v49, %v926_v1 }
 0x169   : > { %928 = vst [vmem:[#allocation5] sm:$0x1] %v927_v50  ;;  %v930_v52 = vmul.f32 %v927_v50, %v918_v43 }
 0x16b   : > { %v931_v53 = vsub.f32 %v929_v51, %v930_v52 }
 0x16d   : > { %932 = vst [vmem:[#allocation6] sm:$0x1] %v931_v53 }
 0x16e PF: > { %p1334_p11 = scmp.lt.s32.totalorder %s1540_s15, 2 }
 0x16f   : > { %s1346_s13 = sshll.u32 (!%p1334_p11), %s1612_s19, 8 }
 0x170   : > { %936 = sbr.rel (%p1334_p11) target bundleno = 400 (0x190), region = 59  ;;  %v1761_v54 = vld [vmem:[#allocation5] ss:$0 sm:$0xff] (!%p1334_p11)  ;;  %s1765_s14 = scalar_lea.vmem (!%p1334_p11), [#allocation2], %s1346_s13 }
 0x171   : > { %v941_v56 = vld [vmem:[%s1765_s14] sm:$0xff] (!%p1334_p11)  ;;  %v942_v57 = vld [vmem:[%s1765_s14 + $0x8] sm:$0xff] (!%p1334_p11)  ;;  %v943_v58 = vld [vmem:[%s1765_s14 + $0x10] sm:$0xff] (!%p1334_p11) }
 0x172   : > { %v980_v59 = vmul.f32 (!%p1334_p11), %v1761_v54, %v941_v56  ;;  %v981_v60 = vmul.f32 (!%p1334_p11), %v1761_v54, %v942_v57  ;;  %v982_v61 = vmul.f32 (!%p1334_p11), %v1761_v54, %v943_v58  ;;  %v944_v62 = vld [vmem:[%s1765_s14 + $0x18] sm:$0xff] (!%p1334_p11)  ;;  %v945_v63 = vld [vmem:[%s1765_s14 + $0x20] sm:$0xff] (!%p1334_p11)  ;;  %v946_v0 = vld [vmem:[%s1765_s14 + $0x28] sm:$0xff] (!%p1334_p11) }
 0x173   : > { %v983_v3 = vmul.f32 (!%p1334_p11), %v1761_v54, %v944_v62  ;;  %v984_v4 = vmul.f32 (!%p1334_p11), %v1761_v54, %v945_v63  ;;  %v985_v6 = vmul.f32 (!%p1334_p11), %v1761_v54, %v946_v0  ;;  %v947_v7 = vld [vmem:[%s1765_s14 + $0x30] sm:$0xff] (!%p1334_p11)  ;;  %v948_v8 = vld [vmem:[%s1765_s14 + $0x38] sm:$0xff] (!%p1334_p11)  ;;  %v949_v17 = vld [vmem:[%s1765_s14 + $0x40] sm:$0xff] (!%p1334_p11) }
 0x174   : > { %v1763_v55 = vld [vmem:[#allocation6] ss:$0 sm:$0xff] (!%p1334_p11)  ;;  %v986_v12 = vmul.f32 (!%p1334_p11), %v1761_v54, %v947_v7  ;;  %v987_v16 = vmul.f32 (!%p1334_p11), %v1761_v54, %v948_v8  ;;  %v950_v18 = vld [vmem:[%s1765_s14 + $0x48] sm:$0xff] (!%p1334_p11)  ;;  %v951_v5 = vld [vmem:[%s1765_s14 + $0x50] sm:$0xff] (!%p1334_p11)  ;;  %v988_v32 = vmul.f32 (!%p1334_p11), %v1761_v54, %v949_v17 }
 0x175   : > { %v1019_v9 = vadd.f32 (!%p1334_p11), %v1763_v55, %v980_v59  ;;  %v1020_v10 = vadd.f32 (!%p1334_p11), %v1763_v55, %v981_v60  ;;  %v1021_v11 = vadd.f32 (!%p1334_p11), %v1763_v55, %v982_v61  ;;  %v1022_v13 = vadd.f32 (!%p1334_p11), %v1763_v55, %v983_v3  ;;  %v952_v23 = vld [vmem:[%s1765_s14 + $0x58] sm:$0xff] (!%p1334_p11)  ;;  %v953_v24 = vld [vmem:[%s1765_s14 + $0x60] sm:$0xff] (!%p1334_p11)  ;;  %v954_v25 = vld [vmem:[%s1765_s14 + $0x68] sm:$0xff] (!%p1334_p11) }
 0x176   : > { %v1023_v14 = vadd.f32 (!%p1334_p11), %v1763_v55, %v984_v4  ;;  %v1024_v15 = vadd.f32 (!%p1334_p11), %v1763_v55, %v985_v6  ;;  %v1025_v22 = vadd.f32 (!%p1334_p11), %v1763_v55, %v986_v12  ;;  %v1026_v29 = vadd.f32 (!%p1334_p11), %v1763_v55, %v987_v16  ;;  %v955_v30 = vld [vmem:[%s1765_s14 + $0x70] sm:$0xff] (!%p1334_p11)  ;;  %v956_v35 = vld [vmem:[%s1765_s14 + $0x78] sm:$0xff] (!%p1334_p11)  ;;  %v957_v47 = vld [vmem:[%s1765_s14 + $0x80] sm:$0xff] (!%p1334_p11) }
 0x177   : > { %v1051_v19 = vmax.f32 %v1019_v9, 0.0  ;;  %v1052_v20 = vmax.f32 %v1020_v10, 0.0  ;;  %v1053_v21 = vmax.f32 %v1021_v11, 0.0  ;;  %v1054_v26 = vmax.f32 %v1022_v13, 0.0  ;;  %v958_v48 = vld [vmem:[%s1765_s14 + $0x88] sm:$0xff]  ;;  %v959_v1 = vld [vmem:[%s1765_s14 + $0x90] sm:$0xff] }
 0x178   : > { %v1055_v27 = vmax.f32 %v1023_v14, 0.0  ;;  %v1056_v28 = vmax.f32 %v1024_v15, 0.0  ;;  %v1057_v31 = vmax.f32 %v1025_v22, 0.0  ;;  %v989_v33 = vmul.f32 %v1761_v54, %v950_v18  ;;  %v960_v53 = vld [vmem:[%s1765_s14 + $0x98] sm:$0xff]  ;;  %v961_v56 = vld [vmem:[%s1765_s14 + $0xa0] sm:$0xff]  ;;  %v962_v57 = vld [vmem:[%s1765_s14 + $0xa8] sm:$0xff] }
 0x179   : > { %1083 = vst [vmem:[%s1626_s29] sm:$0xff] %v1051_v19  ;;  %1084 = vst [vmem:[%s1626_s29 + $0x8] sm:$0xff] %v1052_v20  ;;  %v990_v34 = vmul.f32 %v1761_v54, %v951_v5  ;;  %v1058_v36 = vmax.f32 %v1026_v29, 0.0  ;;  %v991_v37 = vmul.f32 %v1761_v54, %v952_v23  ;;  %v992_v38 = vmul.f32 %v1761_v54, %v953_v24  ;;  %v963_v62 = vld [vmem:[%s1765_s14 + $0xb0] sm:$0xff]  ;;  %v964_v6 = vld [vmem:[%s1765_s14 + $0xb8] sm:$0xff] }
 0x17a   : > { %1085 = vst [vmem:[%s1626_s29 + $0x10] sm:$0xff] %v1053_v21  ;;  %1086 = vst [vmem:[%s1626_s29 + $0x18] sm:$0xff] %v1054_v26  ;;  %v993_v39 = vmul.f32 %v1761_v54, %v954_v25  ;;  %v1027_v40 = vadd.f32 %v1763_v55, %v988_v32  ;;  %v1028_v41 = vadd.f32 %v1763_v55, %v989_v33  ;;  %v965_v5 = vld [vmem:[%s1765_s14 + $0xc0] sm:$0xff]  ;;  %v966_v19 = vld [vmem:[%s1765_s14 + $0xc8] sm:$0xff] }
 0x17b   : > { %1087 = vst [vmem:[%s1626_s29 + $0x20] sm:$0xff] %v1055_v27  ;;  %1088 = vst [vmem:[%s1626_s29 + $0x28] sm:$0xff] %v1056_v28  ;;  %v1029_v2 = vadd.f32 %v1763_v55, %v990_v34  ;;  %v994_v42 = vmul.f32 %v1761_v54, %v955_v30  ;;  %v1030_v43 = vadd.f32 %v1763_v55, %v991_v37  ;;  %v967_v20 = vld [vmem:[%s1765_s14 + $0xd0] sm:$0xff]  ;;  %v968_v25 = vld [vmem:[%s1765_s14 + $0xd8] sm:$0xff] }
 0x17c   : > { %1089 = vst [vmem:[%s1626_s29 + $0x30] sm:$0xff] %v1057_v31  ;;  %1090 = vst [vmem:[%s1626_s29 + $0x38] sm:$0xff] %v1058_v36  ;;  %v1031_v44 = vadd.f32 %v1763_v55, %v992_v38  ;;  %v1032_v45 = vadd.f32 %v1763_v55, %v993_v39  ;;  %v995_v46 = vmul.f32 %v1761_v54, %v956_v35  ;;  %v1059_v49 = vmax.f32 %v1027_v40, 0.0  ;;  %v969_v26 = vld [vmem:[%s1765_s14 + $0xe0] sm:$0xff]  ;;  %v970_v27 = vld [vmem:[%s1765_s14 + $0xe8] sm:$0xff] }
 0x17d   : > { %v1060_v50 = vmax.f32 %v1028_v41, 0.0  ;;  %v1061_v51 = vmax.f32 %v1029_v2, 0.0  ;;  %v1033_v52 = vadd.f32 %v1763_v55, %v994_v42  ;;  %v1062_v58 = vmax.f32 %v1030_v43, 0.0  ;;  %v971_v32 = vld [vmem:[%s1765_s14 + $0xf0] sm:$0xff]  ;;  %v972_v37 = vld [vmem:[%s1765_s14 + $0xf8] sm:$0xff] }
 0x17e   : > { %v1063_v59 = vmax.f32 %v1031_v44, 0.0  ;;  %v1064_v60 = vmax.f32 %v1032_v45, 0.0  ;;  %v1034_v61 = vadd.f32 %v1763_v55, %v995_v46  ;;  %1091 = vst [vmem:[%s1626_s29 + $0x40] sm:$0xff] %v1059_v49  ;;  %v996_v0 = vmul.f32 %v1761_v54, %v957_v47 }
 0x17f   : > { %1092 = vst [vmem:[%s1626_s29 + $0x48] sm:$0xff] %v1060_v50  ;;  %1093 = vst [vmem:[%s1626_s29 + $0x50] sm:$0xff] %v1061_v51  ;;  %v1065_v63 = vmax.f32 %v1033_v52, 0.0  ;;  %v997_v3 = vmul.f32 %v1761_v54, %v958_v48  ;;  %v998_v4 = vmul.f32 %v1761_v54, %v959_v1  ;;  %v999_v8 = vmul.f32 %v1761_v54, %v960_v53 }
 0x180   : > { %1094 = vst [vmem:[%s1626_s29 + $0x58] sm:$0xff] %v1062_v58  ;;  %1095 = vst [vmem:[%s1626_s29 + $0x60] sm:$0xff] %v1063_v59  ;;  %v1066_v7 = vmax.f32 %v1034_v61, 0.0  ;;  %v1000_v9 = vmul.f32 %v1761_v54, %v961_v56  ;;  %v1001_v10 = vmul.f32 %v1761_v54, %v962_v57  ;;  %v1035_v11 = vadd.f32 %v1763_v55, %v996_v0 }
 0x181   : > { %1096 = vst [vmem:[%s1626_s29 + $0x68] sm:$0xff] %v1064_v60  ;;  %1097 = vst [vmem:[%s1626_s29 + $0x70] sm:$0xff] %v1065_v63  ;;  %v1036_v12 = vadd.f32 %v1763_v55, %v997_v3  ;;  %v1037_v13 = vadd.f32 %v1763_v55, %v998_v4  ;;  %v1002_v14 = vmul.f32 %v1761_v54, %v963_v62 }
 0x182   : > { %1098 = vst [vmem:[%s1626_s29 + $0x78] sm:$0xff] %v1066_v7  ;;  %v1038_v15 = vadd.f32 %v1763_v55, %v999_v8  ;;  %v1039_v16 = vadd.f32 %v1763_v55, %v1000_v9  ;;  %v1040_v17 = vadd.f32 %v1763_v55, %v1001_v10  ;;  %v1003_v18 = vmul.f32 %v1761_v54, %v964_v6 }
 0x183   : > { %v1067_v21 = vmax.f32 %v1035_v11, 0.0  ;;  %v1068_v22 = vmax.f32 %v1036_v12, 0.0  ;;  %v1069_v23 = vmax.f32 %v1037_v13, 0.0  ;;  %v1041_v24 = vadd.f32 %v1763_v55, %v1002_v14 }
 0x184   : > { %v1070_v28 = vmax.f32 %v1038_v15, 0.0  ;;  %v1071_v29 = vmax.f32 %v1039_v16, 0.0  ;;  %v1072_v30 = vmax.f32 %v1040_v17, 0.0  ;;  %v1042_v31 = vadd.f32 %v1763_v55, %v1003_v18 }
 0x185   : > { %1099 = vst [vmem:[%s1626_s29 + $0x80] sm:$0xff] %v1067_v21  ;;  %1100 = vst [vmem:[%s1626_s29 + $0x88] sm:$0xff] %v1068_v22  ;;  %v1073_v33 = vmax.f32 %v1041_v24, 0.0  ;;  %v1004_v34 = vmul.f32 %v1761_v54, %v965_v5  ;;  %v1005_v35 = vmul.f32 %v1761_v54, %v966_v19  ;;  %v1006_v36 = vmul.f32 %v1761_v54, %v967_v20 }
 0x186   : > { %1101 = vst [vmem:[%s1626_s29 + $0x90] sm:$0xff] %v1069_v23  ;;  %1102 = vst [vmem:[%s1626_s29 + $0x98] sm:$0xff] %v1070_v28  ;;  %v1074_v38 = vmax.f32 %v1042_v31, 0.0  ;;  %v1007_v39 = vmul.f32 %v1761_v54, %v968_v25  ;;  %v1008_v40 = vmul.f32 %v1761_v54, %v969_v26  ;;  %v1009_v41 = vmul.f32 %v1761_v54, %v970_v27 }
 0x187   : > { %1103 = vst [vmem:[%s1626_s29 + $0xa0] sm:$0xff] %v1071_v29  ;;  %1104 = vst [vmem:[%s1626_s29 + $0xa8] sm:$0xff] %v1072_v30  ;;  %v1043_v2 = vadd.f32 %v1763_v55, %v1004_v34  ;;  %v1044_v42 = vadd.f32 %v1763_v55, %v1005_v35  ;;  %v1045_v43 = vadd.f32 %v1763_v55, %v1006_v36 }
 0x188   : > { %1105 = vst [vmem:[%s1626_s29 + $0xb0] sm:$0xff] %v1073_v33  ;;  %v1010_v44 = vmul.f32 %v1761_v54, %v971_v32  ;;  %1106 = vst [vmem:[%s1626_s29 + $0xb8] sm:$0xff] %v1074_v38  ;;  %v1046_v45 = vadd.f32 %v1763_v55, %v1007_v39  ;;  %v1047_v46 = vadd.f32 %v1763_v55, %v1008_v40 }
 0x189   : > { %v1048_v47 = vadd.f32 %v1763_v55, %v1009_v41  ;;  %v1011_v48 = vmul.f32 %v1761_v54, %v972_v37  ;;  %v1075_v1 = vmax.f32 %v1043_v2, 0.0  ;;  %v1076_v49 = vmax.f32 %v1044_v42, 0.0 }
 0x18a   : > { %v1077_v50 = vmax.f32 %v1045_v43, 0.0  ;;  %v1049_v51 = vadd.f32 %v1763_v55, %v1010_v44  ;;  %v1078_v52 = vmax.f32 %v1046_v45, 0.0  ;;  %v1079_v53 = vmax.f32 %v1047_v46, 0.0 }
 0x18b   : > { %v1080_v56 = vmax.f32 %v1048_v47, 0.0  ;;  %v1050_v57 = vadd.f32 %v1763_v55, %v1011_v48  ;;  %1107 = vst [vmem:[%s1626_s29 + $0xc0] sm:$0xff] %v1075_v1  ;;  %1108 = vst [vmem:[%s1626_s29 + $0xc8] sm:$0xff] %v1076_v49 }
 0x18c   : > { %1109 = vst [vmem:[%s1626_s29 + $0xd0] sm:$0xff] %v1077_v50  ;;  %v1081_v58 = vmax.f32 %v1049_v51, 0.0  ;;  %1110 = vst [vmem:[%s1626_s29 + $0xd8] sm:$0xff] %v1078_v52 }
 0x18d   : > { %1111 = vst [vmem:[%s1626_s29 + $0xe0] sm:$0xff] %v1079_v53  ;;  %1112 = vst [vmem:[%s1626_s29 + $0xe8] sm:$0xff] %v1080_v56  ;;  %v1082_v54 = vmax.f32 %v1050_v57, 0.0 }
 0x18e   : > { %1113 = vst [vmem:[%s1626_s29 + $0xf0] sm:$0xff] %v1081_v58 }
 0x18f   : > { %1114 = vst [vmem:[%s1626_s29 + $0xf8] sm:$0xff] %v1082_v54 }
 0x190 PF: > { %s14_s17 = sadd.s32 1, %s1548_s17   ;;  %s1911_s15 = smov %s1544_s16 }
 0x191   : > { %p11_p12 = scmp.ge.s32.totalorder %s14_s17, 6   ;;  %s1912_s16 = smov %s1914_s18 }
 0x193   :  { %13 = sbr.rel (!%p11_p12) target bundleno = 2 (0x2), region = 122 }

</bundles_post_ra>
